<compile_context>
chip_gen: v7x
topology: tpu7x:2x2x1
jax: 0.10.0
libtpu: 0.0.40
codegen_flags: <defaults>
</compile_context>

<pallas_src>
import functools

import jax
import jax.numpy as jnp
from jax.experimental import pallas as pl
from jax.experimental.pallas import tpu as pltpu

EMB_DIM = 32      # embedding_dimension
OUT_DIM = 2       # out_channels of RGCNConv
NUM_REL = 2       # num_relations
C_PAD = 128       # lane-dense padded output width (avoids masked vst on a 2-wide output)
TI_MAX = 256      # dst (row / "parallel") tile cap
TJ_MAX = 2048     # src (reduction) tile cap -- int8 tile = 2*256*2048 = 1 MiB, x2 pipeline bufs


def _round_up(x, m):
    return (x + m - 1) // m * m


def _pick_tile(n, cap, step):
    """Largest multiple of `step` that is <= cap and divides n (n is a multiple of step)."""
    t = max(step, (min(cap, n) // step) * step)
    while n % t:
        t -= step
    return t


def rgcn_kernel(a_ref, x_ref, inv_ref, w_ref, o_ref, agg_ref, *, ti, tj, d):
    # a_ref:   (NUM_REL, ti, tj) int8     edge counts; rows = dst tile i, cols = src tile j
    # x_ref:   (n_pad, d) f32             full node features, resident in VMEM (const index_map)
    # inv_ref: (NUM_REL, ti, 1) f32       1/in-degree (0 where degree == 0) for dst tile i
    # w_ref:   (NUM_REL+1, d, C_PAD) f32  [root, W0, W1], zero-padded to 128 output lanes
    # o_ref:   (ti, C_PAD) f32            output tile, resident across the j (reduction) axis
    # agg_ref: (NUM_REL*ti, d) f32        scratch: stacked per-relation neighbor sums
    i = pl.program_id(0)
    j = pl.program_id(1)

    @pl.when(j == 0)
    def _():
        agg_ref[...] = jnp.zeros_like(agg_ref)

    # One fused MXU accumulate for both relations:
    #   (NUM_REL*ti, tj) @ (tj, d) -> (NUM_REL*ti, d)
    # int8 counts cast to f32 in VMEM (VPU); leading-dim merge is layout-free (ti % 32 == 0).
    counts = a_ref[...].astype(jnp.float32).reshape(NUM_REL * ti, tj)
    xj = x_ref[pl.ds(pl.multiple_of(j * tj, 128), tj), :]
    agg_ref[...] += jnp.dot(counts, xj, preferred_element_type=jnp.float32)

    @pl.when(j == pl.num_programs(1) - 1)
    def _():
        # out = x_self @ root + sum_r ( (sum_j counts_r @ x) * (1/deg_r) ) @ W_r
        xs = x_ref[pl.ds(pl.multiple_of(i * ti, 32), ti), :]
        out = jnp.dot(xs, w_ref[0], preferred_element_type=jnp.float32)
        for r in range(NUM_REL):
            mean_r = agg_ref[r * ti:(r + 1) * ti, :] * inv_ref[r]   # (ti, d) * (ti, 1)
            out += jnp.dot(mean_r, w_ref[r + 1], preferred_element_type=jnp.float32)
        o_ref[...] = out


def build_count_adjacency(edge_index, edge_type, num_nodes, num_relations):
    """Dense per-relation edge-count adjacency (int8) plus exact inverse in-degree.

    counts[r, i, j] = number of edges j -> i with relation r
    inv_deg[r, i, 0] = 1 / sum_j counts[r, i, j]   (0 if node i has no type-r in-edges)
    """
    src = edge_index[0]
    dst = edge_index[1]
    counts = jnp.zeros((num_relations, num_nodes, num_nodes), jnp.int32)
    counts = counts.at[edge_type, dst, src].add(1)
    deg = counts.sum(axis=2).astype(jnp.float32)                       # (R, N)
    inv_deg = jnp.where(deg > 0, 1.0 / jnp.maximum(deg, 1.0), 0.0)     # scatter-mean semantics
    # TODO(synk): int8 saturates if >127 parallel edges share one (relation, dst, src) pair;
    # widen to int16/bf16 in that (pathological multigraph) case.
    return counts.astype(jnp.int8), inv_deg[..., None]                 # (R,N,N) i8, (R,N,1) f32


def rgcn_forward(x, edge_index, edge_type, weight, root):
    n, d = x.shape
    assert d == EMB_DIM

    # Pad N only to the 128 granule (no tile-sized round-up -> no adjacency padding blow-up).
    n_pad = _round_up(max(n, 128), 128)

    # dst tile: cap at TI_MAX and at n_pad//2 when possible so the "parallel" i axis has >=2
    # tiles (v7x megacore). step=32 keeps int8 sublane packing / reshape merges aligned.
    ti_cap = min(TI_MAX, n_pad // 2) if n_pad >= 256 else n_pad
    ti = _pick_tile(n_pad, ti_cap, 32)
    # reduction tile: as large as comfortable to amortize per-grid-step overhead.
    tj = _pick_tile(n_pad, TJ_MAX, 128)

    counts, inv_deg = build_count_adjacency(edge_index, edge_type, n_pad, NUM_REL)
    x_pad = jnp.zeros((n_pad, d), jnp.float32).at[:n].set(x.astype(jnp.float32))

    # Weights stacked as (R+1, d, C_PAD): [root, W0, W1], zero-padded to 128 output lanes so
    # the output store is a full-lane (unmasked) vst; the wrapper slices back to OUT_DIM.
    w_all = jnp.stack([root] + [weight[r] for r in range(NUM_REL)], axis=0).astype(jnp.float32)
    w_pad = jnp.zeros((NUM_REL + 1, d, C_PAD), jnp.float32).at[:, :, :OUT_DIM].set(w_all)

    grid = (n_pad // ti, n_pad // tj)
    kernel = functools.partial(rgcn_kernel, ti=ti, tj=tj, d=d)

    out_pad = pl.pallas_call(
        kernel,
        out_shape=jax.ShapeDtypeStruct((n_pad, C_PAD), jnp.float32),
        grid_spec=pltpu.PrefetchScalarGridSpec(
            num_scalar_prefetch=0,
            grid=grid,
            in_specs=[
                pl.BlockSpec((NUM_REL, ti, tj), lambda i, j: (0, i, j)),         # int8 counts
                pl.BlockSpec((n_pad, d), lambda i, j: (0, 0)),                   # x: resident
                pl.BlockSpec((NUM_REL, ti, 1), lambda i, j: (0, i, 0)),          # 1/deg (dst i)
                pl.BlockSpec((NUM_REL + 1, d, C_PAD), lambda i, j: (0, 0, 0)),   # weights
            ],
            out_specs=pl.BlockSpec((ti, C_PAD), lambda i, j: (i, 0)),
            scratch_shapes=[pltpu.VMEM((NUM_REL * ti, d), jnp.float32)],
        ),
        compiler_params=pltpu.CompilerParams(
            dimension_semantics=("parallel", "arbitrary"),
            vmem_limit_bytes=32 * 1024 * 1024,
        ),
    )(counts, x_pad, inv_deg, w_pad)

    return out_pad[:n, :OUT_DIM]


def rgcn_reference(x, edge_index, edge_type, weight, root):
    """Pure-JAX reference for the same math (dense normalized adjacency)."""
    n = x.shape[0]
    src, dst = edge_index[0], edge_index[1]
    adj = jnp.zeros((NUM_REL, n, n), jnp.float32).at[edge_type, dst, src].add(1.0)
    deg = adj.sum(axis=2, keepdims=True)
    adj = jnp.where(deg > 0, adj / jnp.maximum(deg, 1.0), 0.0)
    out = x @ root
    for r in range(NUM_REL):
        out = out + (adj[r] @ x) @ weight[r]
    return out


if __name__ == "__main__":
    key = jax.random.PRNGKey(0)
    k_x, k_ei, k_et, k_w, k_r = jax.random.split(key, 5)

    N = 8    # number of nodes
    E = 16   # number of edges

    x = jax.random.normal(k_x, (N, EMB_DIM), jnp.float32)
    edge_index = jax.random.randint(k_ei, (2, E), 0, N, dtype=jnp.int32)
    edge_type = jax.random.randint(k_et, (E,), 0, NUM_REL, dtype=jnp.int32)

    # Deterministic parameter init (glorot-style); shapes from RGCNConv(32, 2, num_relations=2,
    # bias=False): weight (R, in, out), root (in, out).
    w_scale = (6.0 / (EMB_DIM + OUT_DIM)) ** 0.5
    weight = jax.random.uniform(k_w, (NUM_REL, EMB_DIM, OUT_DIM), jnp.float32,
                                -w_scale, w_scale)
    root = jax.random.uniform(k_r, (EMB_DIM, OUT_DIM), jnp.float32,
                              -w_scale, w_scale)

    out = rgcn_forward(x, edge_index, edge_type, weight, root)
    out = jax.block_until_ready(out)

    ref = rgcn_reference(x, edge_index, edge_type, weight, root)
    assert out.shape == (N, OUT_DIM)
    assert jnp.allclose(out, ref, atol=1e-4, rtol=1e-4), "mismatch vs reference"

    print("KERNEL_OK")
</pallas_src>

<mosaic_0001>
module attributes {stable_mosaic.version = 11 : i64} {
  func.func @rgcn_kernel(%arg0: i32, %arg1: i32, %arg2: memref<2x128x128xi8, #tpu.memory_space<vmem>>, %arg3: memref<128x32xf32, #tpu.memory_space<vmem>>, %arg4: memref<2x128x1xf32, #tpu.memory_space<vmem>>, %arg5: memref<3x32x128xf32, #tpu.memory_space<vmem>>, %arg6: memref<128x128xf32, #tpu.memory_space<vmem>>, %arg7: memref<256x32xf32, #tpu.memory_space<vmem>>) attributes {dimension_semantics = [#tpu.dimension_semantics<parallel>, #tpu.dimension_semantics<arbitrary>], iteration_bounds = array<i64: 1, 1>, scalar_prefetch = 0 : i64, scratch_operands = 1 : i64, tpu.core_type = #tpu.core_type<tc>, window_params = [{transform_indices = @transform_0, window_bounds = array<i64: 2, 128, 128>}, {pipeline_mode = #tpu.pipeline_mode<synchronous>, transform_indices = @transform_1, window_bounds = array<i64: 128, 32>}, {transform_indices = @transform_2, window_bounds = array<i64: 2, 128, 1>}, {pipeline_mode = #tpu.pipeline_mode<synchronous>, transform_indices = @transform_3, window_bounds = array<i64: 3, 32, 128>}, {transform_indices = @transform_4, window_bounds = array<i64: 128, 128>}]} {
    %c0_i32 = arith.constant 0 : i32
    %0 = arith.cmpi eq, %arg1, %c0_i32 : i32
    %1 = arith.extui %0 : i1 to i32
    %c0_i32_0 = arith.constant 0 : i32
    %2 = arith.cmpi ne, %1, %c0_i32_0 : i32
    scf.if %2 {
      %cst_10 = arith.constant 0.000000e+00 : f32
      %17 = vector.broadcast %cst_10 : f32 to vector<256x32xf32>
      %c0_11 = arith.constant 0 : index
      %c0_12 = arith.constant 0 : index
      %18 = vector.load %arg7[%c0_11, %c0_12] : memref<256x32xf32, #tpu.memory_space<vmem>>, vector<256x32xf32>
      tpu.vector_store %arg7[%c0_11, %c0_12], %17 {strides = array<i32>} : memref<256x32xf32, #tpu.memory_space<vmem>>, vector<256x32xf32>,
    } else {
    }
    %c0 = arith.constant 0 : index
    %c0_1 = arith.constant 0 : index
    %c0_2 = arith.constant 0 : index
    %3 = vector.load %arg2[%c0, %c0_1, %c0_2] : memref<2x128x128xi8, #tpu.memory_space<vmem>>, vector<2x128x128xi8>
    %4 = arith.sitofp %3 : vector<2x128x128xi8> to vector<2x128x128xf32>
    %5 = vector.shape_cast %4 : vector<2x128x128xf32> to vector<256x128xf32>
    %c128_i32 = arith.constant 128 : i32
    %6 = arith.muli %arg1, %c128_i32 : i32
    %7 = tpu.assume_multiple %6, 128 : i32
    %8 = arith.index_cast %7 : i32 to index
    %c0_3 = arith.constant 0 : index
    %9 = vector.load %arg3[%8, %c0_3] : memref<128x32xf32, #tpu.memory_space<vmem>>, vector<128x32xf32>
    %c0_4 = arith.constant 0 : index
    %c0_5 = arith.constant 0 : index
    %10 = vector.load %arg7[%c0_4, %c0_5] : memref<256x32xf32, #tpu.memory_space<vmem>>, vector<256x32xf32>
    %cst = arith.constant dense<0.000000e+00> : vector<256x32xf32>
    %11 = tpu.matmul %5, %9, %cst {dimension_numbers = #tpu.dot_dimension_numbers<[1], [0], [0], [1], [0, 0, 1, 1], [], []>} : vector<256x128xf32>, vector<128x32xf32>, vector<256x32xf32> -> vector<256x32xf32>
    %12 = arith.addf %10, %11 : vector<256x32xf32>
    %c0_6 = arith.constant 0 : index
    %c0_7 = arith.constant 0 : index
    %13 = vector.load %arg7[%c0_6, %c0_7] : memref<256x32xf32, #tpu.memory_space<vmem>>, vector<256x32xf32>
    tpu.vector_store %arg7[%c0_6, %c0_7], %12 {strides = array<i32>} : memref<256x32xf32, #tpu.memory_space<vmem>>, vector<256x32xf32>,
    %c0_i32_8 = arith.constant 0 : i32
    %14 = arith.cmpi eq, %arg1, %c0_i32_8 : i32
    %15 = arith.extui %14 : i1 to i32
    %c0_i32_9 = arith.constant 0 : i32
    %16 = arith.cmpi ne, %15, %c0_i32_9 : i32
    scf.if %16 {
      %c128_i32_10 = arith.constant 128 : i32
      %17 = arith.muli %arg0, %c128_i32_10 : i32
      %18 = tpu.assume_multiple %17, 32 : i32
      %19 = arith.index_cast %18 : i32 to index
      %c0_11 = arith.constant 0 : index
      %20 = vector.load %arg3[%19, %c0_11] : memref<128x32xf32, #tpu.memory_space<vmem>>, vector<128x32xf32>
      %c0_12 = arith.constant 0 : index
      %c0_13 = arith.constant 0 : index
      %c0_14 = arith.constant 0 : index
      %21 = vector.load %arg5[%c0_12, %c0_13, %c0_14] : memref<3x32x128xf32, #tpu.memory_space<vmem>>, vector<1x32x128xf32>
      %22 = vector.shape_cast %21 : vector<1x32x128xf32> to vector<32x128xf32>
      %cst_15 = arith.constant dense<0.000000e+00> : vector<128x128xf32>
      %23 = tpu.matmul %20, %22, %cst_15 {dimension_numbers = #tpu.dot_dimension_numbers<[1], [0], [0], [1], [0, 0, 1, 1], [], []>} : vector<128x32xf32>, vector<32x128xf32>, vector<128x128xf32> -> vector<128x128xf32>
      %c0_16 = arith.constant 0 : index
      %c0_17 = arith.constant 0 : index
      %24 = vector.load %arg7[%c0_16, %c0_17] : memref<256x32xf32, #tpu.memory_space<vmem>>, vector<128x32xf32>
      %c0_18 = arith.constant 0 : index
      %c0_19 = arith.constant 0 : index
      %c0_20 = arith.constant 0 : index
      %25 = vector.load %arg4[%c0_18, %c0_19, %c0_20] : memref<2x128x1xf32, #tpu.memory_space<vmem>>, vector<1x128x1xf32>
      %26 = vector.shape_cast %25 : vector<1x128x1xf32> to vector<128x1xf32>
      %27 = vector.broadcast %26 : vector<128x1xf32> to vector<128x32xf32>
      %28 = arith.mulf %24, %27 : vector<128x32xf32>
      %c1 = arith.constant 1 : index
      %c0_21 = arith.constant 0 : index
      %c0_22 = arith.constant 0 : index
      %29 = vector.load %arg5[%c1, %c0_21, %c0_22] : memref<3x32x128xf32, #tpu.memory_space<vmem>>, vector<1x32x128xf32>
      %30 = vector.shape_cast %29 : vector<1x32x128xf32> to vector<32x128xf32>
      %cst_23 = arith.constant dense<0.000000e+00> : vector<128x128xf32>
      %31 = tpu.matmul %28, %30, %cst_23 {dimension_numbers = #tpu.dot_dimension_numbers<[1], [0], [0], [1], [0, 0, 1, 1], [], []>} : vector<128x32xf32>, vector<32x128xf32>, vector<128x128xf32> -> vector<128x128xf32>
      %32 = arith.addf %23, %31 : vector<128x128xf32>
      %c128 = arith.constant 128 : index
      %c0_24 = arith.constant 0 : index
      %33 = vector.load %arg7[%c128, %c0_24] : memref<256x32xf32, #tpu.memory_space<vmem>>, vector<128x32xf32>
      %c1_25 = arith.constant 1 : index
      %c0_26 = arith.constant 0 : index
      %c0_27 = arith.constant 0 : index
      %34 = vector.load %arg4[%c1_25, %c0_26, %c0_27] : memref<2x128x1xf32, #tpu.memory_space<vmem>>, vector<1x128x1xf32>
      %35 = vector.shape_cast %34 : vector<1x128x1xf32> to vector<128x1xf32>
      %36 = vector.broadcast %35 : vector<128x1xf32> to vector<128x32xf32>
      %37 = arith.mulf %33, %36 : vector<128x32xf32>
      %c2 = arith.constant 2 : index
      %c0_28 = arith.constant 0 : index
      %c0_29 = arith.constant 0 : index
      %38 = vector.load %arg5[%c2, %c0_28, %c0_29] : memref<3x32x128xf32, #tpu.memory_space<vmem>>, vector<1x32x128xf32>
      %39 = vector.shape_cast %38 : vector<1x32x128xf32> to vector<32x128xf32>
      %cst_30 = arith.constant dense<0.000000e+00> : vector<128x128xf32>
      %40 = tpu.matmul %37, %39, %cst_30 {dimension_numbers = #tpu.dot_dimension_numbers<[1], [0], [0], [1], [0, 0, 1, 1], [], []>} : vector<128x32xf32>, vector<32x128xf32>, vector<128x128xf32> -> vector<128x128xf32>
      %41 = arith.addf %32, %40 : vector<128x128xf32>
      %c0_31 = arith.constant 0 : index
      %c0_32 = arith.constant 0 : index
      %42 = vector.load %arg6[%c0_31, %c0_32] : memref<128x128xf32, #tpu.memory_space<vmem>>, vector<128x128xf32>
      tpu.vector_store %arg6[%c0_31, %c0_32], %41 {strides = array<i32>} : memref<128x128xf32, #tpu.memory_space<vmem>>, vector<128x128xf32>,
    } else {
    }
    return
  }
  func.func @transform_0(%arg0: i32, %arg1: i32) -> (i32, i32, i32) {
    %c0_i32 = arith.constant 0 : i32
    %c0_i32_0 = arith.constant 0 : i32
    return %c0_i32, %arg0, %arg1 : i32, i32, i32
  }
  func.func @transform_1(%arg0: i32, %arg1: i32) -> (i32, i32) {
    %c0_i32 = arith.constant 0 : i32
    %c0_i32_0 = arith.constant 0 : i32
    %c0_i32_1 = arith.constant 0 : i32
    return %c0_i32, %c0_i32_0 : i32, i32
  }
  func.func @transform_2(%arg0: i32, %arg1: i32) -> (i32, i32, i32) {
    %c0_i32 = arith.constant 0 : i32
    %c0_i32_0 = arith.constant 0 : i32
    %c0_i32_1 = arith.constant 0 : i32
    return %c0_i32, %arg0, %c0_i32_0 : i32, i32, i32
  }
  func.func @transform_3(%arg0: i32, %arg1: i32) -> (i32, i32, i32) {
    %c0_i32 = arith.constant 0 : i32
    %c0_i32_0 = arith.constant 0 : i32
    %c0_i32_1 = arith.constant 0 : i32
    %c0_i32_2 = arith.constant 0 : i32
    return %c0_i32, %c0_i32_0, %c0_i32_1 : i32, i32, i32
  }
  func.func @transform_4(%arg0: i32, %arg1: i32) -> (i32, i32) {
    %c0_i32 = arith.constant 0 : i32
    %c0_i32_0 = arith.constant 0 : i32
    return %arg0, %c0_i32 : i32, i32
  }
}

</mosaic_0001>

<bundles_post_ra>
// kernel: tpu_custom_call.1
= control target key start
LH: loop header
LB: loop body
LE: loop exit
PB: predicated region body
PF: predicated region fallthrough
CT: control target
= control target key end

     0   :  { %v1865_v5 = vmov 0   ;;  %s2397_s0 = inlined_call_operand.vmem [shape: s8[2,128,128], index: 0, kind: input, shape index: {}]   ;;  %s2398_s1 = inlined_call_operand.vmem [shape: f32[128,32], index: 1, kind: input, shape index: {}]   ;;  %s2399_s2 = inlined_call_operand.vmem [shape: f32[2,128,1], index: 2, kind: input, shape index: {}]   ;;  %s2400_s3 = inlined_call_operand.vmem [shape: f32[3,32,128], index: 3, kind: input, shape index: {}]   ;;  %s2401_s4 = inlined_call_operand.hbm [shape: f32[128,128], index: 4, kind: output, shape index: {}]  }
   0x1   :  { %v1898_v0 = vld [vmem:[%s2398_s1] sm:$0xff]  ;;  %v1903_v1 = vld [vmem:[%s2398_s1 + $0x8] sm:$0xff]  ;;  %v1908_v2 = vld [vmem:[%s2398_s1 + $0x10] sm:$0xff]  ;;  %1839 = vset.pattern.permute.xlu0 %v1865_v5  ;;  %1840 = vset.pattern.permute.xlu1 %v1865_v5 }
   0x2   :  { %v1742_v3 = vpack.c.bf16 %v1903_v1, %v1898_v0  ;;  %v1915_v4 = vld [vmem:[%s2398_s1 + $0x18] sm:$0xff]  ;;  %v1922_v7 = vld [vmem:[%s2398_s1 + $0x20] sm:$0xff]  ;;  %v1927_v8 = vld [vmem:[%s2398_s1 + $0x28] sm:$0xff] }
   0x3   :  { %v1746_v6 = vpack.c.bf16 %v1915_v4, %v1908_v2  ;;  %v1750_v9 = vpack.c.bf16 %v1927_v8, %v1922_v7  ;;  %v1934_v10 = vld [vmem:[%s2397_s0] sm:$0xff]  ;;  %v1939_v11 = vld [vmem:[%s2398_s1 + $0x30] sm:$0xff]  ;;  %v1944_v12 = vld [vmem:[%s2398_s1 + $0x38] sm:$0xff] }
   0x4   :  { %1743 = vmatprep.subr.bf16.mxu0 %v1742_v3  ;;  %v63_v13 = vunpack.c.0.s8 %v1934_v10  ;;  %v510_v14 = vld [vmem:[%s2399_s2 + $0x10] sm:$0xff]  ;;  %v512_v15 = vld [vmem:[%s2399_s2 + $0x20] sm:$0xff]  ;;  %v1754_v17 = vpack.c.bf16 %v1944_v12, %v1939_v11  ;;  %v511_v18 = vld [vmem:[%s2399_s2 + $0x18] sm:$0xff] }
   0x5   :  { %1745 = vmatpush3.bf16.msra.mxu0 %v1742_v3  ;;  %536 = vperm.xlu0 %1839, %v510_v14   ;;  %v1961_v19 = vld [vmem:[%s2398_s1 + $0x40] sm:$0xff]  ;;  %v1966_v20 = vld [vmem:[%s2398_s1 + $0x48] sm:$0xff]  ;;  %v514_v23 = vld [vmem:[%s2399_s2 + $0x30] sm:$0xff] }
   0x6   :  { %1747 = vmatprep.subr.bf16.mxu0 %v1746_v6  ;;  %v95_v16 = vcvt.s32.f32 %v63_v13  ;;  %546 = vperm.xlu1 %1840, %v512_v15   ;;  %v513_v21 = vld [vmem:[%s2399_s2 + $0x28] sm:$0xff]  ;;  %v1758_v22 = vpack.c.bf16 %v1966_v20, %v1961_v19  ;;  %v1979_v24 = vld [vmem:[%s2398_s1 + $0x50] sm:$0xff]  ;;  %v1984_v25 = vld [vmem:[%s2398_s1 + $0x58] sm:$0xff] }
   0x7   :  { %v515_v26 = vld [vmem:[%s2399_s2 + $0x38] sm:$0xff]  ;;  %v1762_v27 = vpack.c.bf16 %v1984_v25, %v1979_v24  ;;  %v1994_v28 = vld [vmem:[%s2398_s1 + $0x60] sm:$0xff]  ;;  %v2002_v30 = vld [vmem:[%s2398_s1 + $0x68] sm:$0xff] }
   0x8   :  { %1598 = vmatprep.mubr.f32.mxu0 %v95_v16  ;;  %v516_v29 = vld [vmem:[%s2399_s2 + $0x40] sm:$0xff]  ;;  %v517_v31 = vld [vmem:[%s2399_s2 + $0x48] sm:$0xff] }
   0x9   :  { %1749 = vmatpush3.bf16.msra.mxu0 %v1746_v6  ;;  %541 = vperm.xlu0 %1839, %v511_v18  }
   0xa   :  { %1751 = vmatprep.subr.bf16.mxu0 %v1750_v9  ;;  %551 = vperm.xlu1 %1840, %v513_v21  }
   0xd   :  { %1753 = vmatpush3.bf16.msra.mxu0 %v1750_v9  ;;  %556 = vperm.xlu0 %1839, %v514_v23  }
   0xe   :  { %1755 = vmatprep.subr.bf16.mxu0 %v1754_v17  ;;  %561 = vperm.xlu1 %1840, %v515_v26  }
  0x11   :  { %1757 = vmatpush3.bf16.msra.mxu0 %v1754_v17 }
  0x12   :  { %1759 = vmatprep.subr.bf16.mxu0 %v1758_v22 }
  0x13   :  { %9 = vsyncpa [#allocation4], 0  ;;  %566 = vperm.xlu0 %1839, %v516_v29   ;;  %v1766_v32 = vpack.c.bf16 %v2002_v30, %v1994_v28  ;;  %571 = vperm.xlu1 %1840, %v517_v31   ;;  %v518_v33 = vld [vmem:[%s2399_s2 + $0x50] sm:$0xff]  ;;  %v2020_v35 = vld [vmem:[%s2398_s1 + $0x78] sm:$0xff]  ;;  %v64_v40 = vunpack.c.1.s8 %v1934_v10  ;;  %v65_v41 = vunpack.c.2.s8 %v1934_v10  ;;  %v66_v46 = vunpack.c.3.s8 %v1934_v10 }
  0x14   :  { %v2015_v34 = vld [vmem:[%s2398_s1 + $0x70] sm:$0xff]  ;;  %v519_v36 = vld [vmem:[%s2399_s2 + $0x58] sm:$0xff]  ;;  %v520_v38 = vld [vmem:[%s2399_s2 + $0x60] sm:$0xff]  ;;  %vm22_vm0 = vcmask 261120  }
  0x15   :  { %1761 = vmatpush3.bf16.msra.mxu0 %v1758_v22  ;;  %v1770_v37 = vpack.c.bf16 %v2020_v35, %v2015_v34  ;;  %v521_v39 = vld [vmem:[%s2399_s2 + $0x68] sm:$0xff]  ;;  %v522_v43 = vld [vmem:[%s2399_s2 + $0x70] sm:$0xff]  ;;  %v523_v44 = vld [vmem:[%s2399_s2 + $0x78] sm:$0xff]  ;;  %v96_v45 = vcvt.s32.f32 %v64_v40  ;;  %v97_v47 = vcvt.s32.f32 %v65_v41  ;;  %v98_v51 = vcvt.s32.f32 %v66_v46 }
  0x16   :  { %1763 = vmatprep.subr.bf16.mxu0 %v1762_v27  ;;  %v56_v42 = vld [vmem:[%s2397_s0 + $0x8] sm:$0xff]  ;;  %v1422_v49 = vld [vmem:[%s2399_s2 + $0x80] sm:$0xff]  ;;  %v57_v55 = vld [vmem:[%s2397_s0 + $0x10] sm:$0xff]  ;;  %v1866_v40 = vmov 0.0  }
  0x17   :  { %576 = vperm.xlu0 %1839, %v518_v33   ;;  %581 = vperm.xlu1 %1840, %v519_v36   ;;  %v67_v48 = vunpack.c.0.s8 %v56_v42  ;;  %v1423_v50 = vld [vmem:[%s2399_s2 + $0x88] sm:$0xff]  ;;  %v68_v52 = vunpack.c.1.s8 %v56_v42  ;;  %v69_v54 = vunpack.c.2.s8 %v56_v42  ;;  %v1424_v56 = vld [vmem:[%s2399_s2 + $0x90] sm:$0xff]  ;;  %v1425_v57 = vld [vmem:[%s2399_s2 + $0x98] sm:$0xff]  ;;  %v70_v59 = vunpack.c.3.s8 %v56_v42  ;;  %24 = vst.msk [vmem:[#allocation2 + $0x8] sm:$0xff] %vm22_vm0, %v1866_v40 }
  0x18   :  { %v71_v61 = vunpack.c.0.s8 %v57_v55  ;;  %v1426_v62 = vld [vmem:[%s2399_s2 + $0xa0] sm:$0xff]  ;;  %v1427_v63 = vld [vmem:[%s2399_s2 + $0xa8] sm:$0xff]  ;;  %v72_v5 = vunpack.c.1.s8 %v57_v55  ;;  %v73_v9 = vunpack.c.2.s8 %v57_v55  ;;  %v2069_v10 = vld [vmem:[%s2397_s0 + $0x18] sm:$0xff]  ;;  %v74_v16 = vunpack.c.3.s8 %v57_v55  ;;  %23 = vst.msk [vmem:[#allocation2] sm:$0xff] %vm22_vm0, %v1866_v40 }
  0x19   :  { %1765 = vmatpush3.bf16.msra.mxu0 %v1762_v27  ;;  %v99_v53 = vcvt.s32.f32 %v67_v48  ;;  %v100_v58 = vcvt.s32.f32 %v68_v52  ;;  %v101_v60 = vcvt.s32.f32 %v69_v54  ;;  %v102_v3 = vcvt.s32.f32 %v70_v59  ;;  %v1428_v13 = vld [vmem:[%s2399_s2 + $0xb0] sm:$0xff]  ;;  %v1429_v14 = vld [vmem:[%s2399_s2 + $0xb8] sm:$0xff]  ;;  %v1430_v21 = vld [vmem:[%s2399_s2 + $0xc0] sm:$0xff]  ;;  %25 = vst.msk [vmem:[#allocation2 + $0x10] sm:$0xff] %vm22_vm0, %v1866_v40 }
  0x1a   :  { %1767 = vmatprep.subr.bf16.mxu0 %v1766_v32  ;;  %v103_v6 = vcvt.s32.f32 %v71_v61  ;;  %v104_v15 = vcvt.s32.f32 %v72_v5  ;;  %v105_v17 = vcvt.s32.f32 %v73_v9  ;;  %v75_v18 = vunpack.c.0.s8 %v2069_v10  ;;  %v1431_v22 = vld [vmem:[%s2399_s2 + $0xc8] sm:$0xff]  ;;  %v2089_v31 = vld [vmem:[%s2397_s0 + $0x20] sm:$0xff]  ;;  %v1433_v33 = vld [vmem:[%s2399_s2 + $0xd8] sm:$0xff]  ;;  %26 = vst.msk [vmem:[#allocation2 + $0x18] sm:$0xff] %vm22_vm0, %v1866_v40 }
  0x1b   :  { %586 = vperm.xlu0 %1839, %v520_v38   ;;  %591 = vperm.xlu1 %1840, %v521_v39   ;;  %v106_v23 = vcvt.s32.f32 %v74_v16  ;;  %v76_v26 = vunpack.c.1.s8 %v2069_v10  ;;  %v77_v29 = vunpack.c.2.s8 %v2069_v10  ;;  %v79_v39 = vunpack.c.0.s8 %v2089_v31  ;;  %27 = vst.msk [vmem:[#allocation2 + $0x20] sm:$0xff] %vm22_vm0, %v1866_v40  ;;  %28 = vst.msk [vmem:[#allocation2 + $0x28] sm:$0xff] %vm22_vm0, %v1866_v40  ;;  %v1434_v41 = vld [vmem:[%s2399_s2 + $0xe0] sm:$0xff]  ;;  %v1435_v42 = vld [vmem:[%s2399_s2 + $0xe8] sm:$0xff] }
  0x1c   :  { %v107_v27 = vcvt.s32.f32 %v75_v18  ;;  %29 = vst.msk [vmem:[#allocation2 + $0x30] sm:$0xff] %vm22_vm0, %v1866_v40  ;;  %30 = vst.msk [vmem:[#allocation2 + $0x38] sm:$0xff] %vm22_vm0, %v1866_v40  ;;  %v81_v46 = vunpack.c.2.s8 %v2089_v31  ;;  %v508_v48 = vld [vmem:[%s2399_s2] sm:$0xff]  ;;  %v1436_v54 = vld [vmem:[%s2399_s2 + $0xf0] sm:$0xff] }
  0x1d   :  { %1769 = vmatpush3.bf16.msra.mxu0 %v1766_v32  ;;  %v1432_v32 = vld [vmem:[%s2399_s2 + $0xd0] sm:$0xff]  ;;  %v108_v36 = vcvt.s32.f32 %v76_v26  ;;  %v109_v38 = vcvt.s32.f32 %v77_v29  ;;  %31 = vst.msk [vmem:[#allocation2 + $0x40] sm:$0xff] %vm22_vm0, %v1866_v40  ;;  %32 = vst.msk [vmem:[#allocation2 + $0x48] sm:$0xff] %vm22_vm0, %v1866_v40  ;;  %v1437_v55 = vld [vmem:[%s2399_s2 + $0xf8] sm:$0xff] }
  0x1e   :  { %1771 = vmatprep.subr.bf16.mxu0 %v1770_v37  ;;  %33 = vst.msk [vmem:[#allocation2 + $0x50] sm:$0xff] %vm22_vm0, %v1866_v40  ;;  %34 = vst.msk [vmem:[#allocation2 + $0x58] sm:$0xff] %vm22_vm0, %v1866_v40  ;;  %v113_v52 = vcvt.s32.f32 %v81_v46 }
  0x1f   :  { %596 = vperm.xlu0 %1839, %v522_v43   ;;  %601 = vperm.xlu1 %1840, %v523_v44   ;;  %35 = vst.msk [vmem:[#allocation2 + $0x60] sm:$0xff] %vm22_vm0, %v1866_v40  ;;  %36 = vst.msk [vmem:[#allocation2 + $0x68] sm:$0xff] %vm22_vm0, %v1866_v40  ;;  %v80_v44 = vunpack.c.1.s8 %v2089_v31 }
  0x20   :  { %37 = vst.msk [vmem:[#allocation2 + $0x70] sm:$0xff] %vm22_vm0, %v1866_v40  ;;  %38 = vst.msk [vmem:[#allocation2 + $0x78] sm:$0xff] %vm22_vm0, %v1866_v40 }
  0x21   :  { %1773 = vmatpush3.bf16.msra.mxu0 %v1770_v37  ;;  %v78_v37 = vunpack.c.3.s8 %v2069_v10  ;;  %39 = vst.msk [vmem:[#allocation2 + $0x80] sm:$0xff] %vm22_vm0, %v1866_v40  ;;  %40 = vst.msk [vmem:[#allocation2 + $0x88] sm:$0xff] %vm22_vm0, %v1866_v40 }
  0x22   :  { %41 = vst.msk [vmem:[#allocation2 + $0x90] sm:$0xff] %vm22_vm0, %v1866_v40  ;;  %42 = vst.msk [vmem:[#allocation2 + $0x98] sm:$0xff] %vm22_vm0, %v1866_v40 }
  0x23   :  { %1046 = vperm.xlu0 %1839, %v1422_v49   ;;  %1051 = vperm.xlu1 %1840, %v1423_v50   ;;  %43 = vst.msk [vmem:[#allocation2 + $0xa0] sm:$0xff] %vm22_vm0, %v1866_v40  ;;  %44 = vst.msk [vmem:[#allocation2 + $0xa8] sm:$0xff] %vm22_vm0, %v1866_v40  ;;  %v110_v43 = vcvt.s32.f32 %v78_v37  ;;  %v509_v49 = vld [vmem:[%s2399_s2 + $0x8] sm:$0xff]  ;;  %v112_v50 = vcvt.s32.f32 %v80_v44  ;;  %v1388_v37 = vld [vmem:[%s2400_s3 + $0x30] sm:$0xff] }
  0x24   :  { %1599 = vmatmul.mubr.f32.vlgmr.msra.gmra.mrb[0].mxu0 %v96_v45  ;;  %45 = vst.msk [vmem:[#allocation2 + $0xb0] sm:$0xff] %vm22_vm0, %v1866_v40  ;;  %46 = vst.msk [vmem:[#allocation2 + $0xb8] sm:$0xff] %vm22_vm0, %v1866_v40  ;;  %v111_v45 = vcvt.s32.f32 %v79_v39 }
  0x25   :  { %1601 = vmatprep.mubr.f32.mxu0 %v97_v47  ;;  %47 = vst.msk [vmem:[#allocation2 + $0xc0] sm:$0xff] %vm22_vm0, %v1866_v40  ;;  %48 = vst.msk [vmem:[#allocation2 + $0xc8] sm:$0xff] %vm22_vm0, %v1866_v40  ;;  %v60_v47 = vld [vmem:[%s2397_s0 + $0x28] sm:$0xff] }
  0x26   :  { %49 = vst.msk [vmem:[#allocation2 + $0xd0] sm:$0xff] %vm22_vm0, %v1866_v40  ;;  %50 = vst.msk [vmem:[#allocation2 + $0xd8] sm:$0xff] %vm22_vm0, %v1866_v40  ;;  %v85_v59 = vunpack.c.2.s8 %v60_v47 }
  0x27   :  { %1056 = vperm.xlu0 %1839, %v1424_v56   ;;  %1061 = vperm.xlu1 %1840, %v1425_v57   ;;  %51 = vst.msk [vmem:[#allocation2 + $0xe0] sm:$0xff] %vm22_vm0, %v1866_v40  ;;  %52 = vst.msk [vmem:[#allocation2 + $0xe8] sm:$0xff] %vm22_vm0, %v1866_v40  ;;  %v84_v57 = vunpack.c.1.s8 %v60_v47 }
  0x28   :  { %1602 = vmatmul.mubr.f32.gmra.mrb[2].mxu0 %v98_v51  ;;  %53 = vst.msk [vmem:[#allocation2 + $0xf0] sm:$0xff] %vm22_vm0, %v1866_v40  ;;  %54 = vst.msk [vmem:[#allocation2 + $0xf8] sm:$0xff] %vm22_vm0, %v1866_v40  ;;  %v82_v51 = vunpack.c.3.s8 %v2089_v31  ;;  %v488_v40 = vld [vmem:[%s2400_s3] sm:$0xff] }
  0x29   :  { %1604 = vmatprep.mubr.f32.mxu0 %v99_v53  ;;  %v83_v53 = vunpack.c.0.s8 %v60_v47  ;;  %v116_v61 = vcvt.s32.f32 %v84_v57 }
  0x2a   :  { %v114_v56 = vcvt.s32.f32 %v82_v51 }
  0x2b   :  { %1066 = vperm.xlu0 %1839, %v1426_v62   ;;  %1071 = vperm.xlu1 %1840, %v1427_v63   ;;  %v86_v62 = vunpack.c.3.s8 %v60_v47  ;;  %v117_v63 = vcvt.s32.f32 %v85_v59 }
  0x2c   :  { %1605 = vmatmul.mubr.f32.gmra.mrb[4].mxu0 %v100_v58  ;;  %v115_v58 = vcvt.s32.f32 %v83_v53 }
  0x2d   :  { %1607 = vmatprep.mubr.f32.mxu0 %v101_v60  ;;  %v61_v60 = vld [vmem:[%s2397_s0 + $0x30] sm:$0xff]  ;;  %v118_v5 = vcvt.s32.f32 %v86_v62 }
  0x2e   :  { %v89_v10 = vunpack.c.2.s8 %v61_v60 }
  0x2f   :  { %1076 = vperm.xlu0 %1839, %v1428_v13   ;;  %1081 = vperm.xlu1 %1840, %v1429_v14   ;;  %v62_v13 = vld [vmem:[%s2397_s0 + $0x38] sm:$0xff] }
  0x30   :  { %1608 = vmatmul.mubr.f32.gmra.mrb[6].mxu0 %v102_v3  ;;  %v87_v3 = vunpack.c.0.s8 %v61_v60  ;;  %v121_v16 = vcvt.s32.f32 %v89_v10 }
  0x31   :  { %1610 = vmatprep.mubr.f32.mxu0 %v103_v6  ;;  %v88_v6 = vunpack.c.1.s8 %v61_v60 }
  0x32   :  { %v119_v9 = vcvt.s32.f32 %v87_v3 }
  0x33   :  { %1086 = vperm.xlu0 %1839, %v1430_v21   ;;  %1091 = vperm.xlu1 %1840, %v1431_v22   ;;  %v120_v14 = vcvt.s32.f32 %v88_v6  ;;  %v92_v21 = vunpack.c.1.s8 %v62_v13 }
  0x34   :  { %1611 = vmatmul.mubr.f32.gmra.mrb[8].mxu0 %v104_v15  ;;  %v90_v15 = vunpack.c.3.s8 %v61_v60 }
  0x35   :  { %1613 = vmatprep.mubr.f32.mxu0 %v105_v17  ;;  %v91_v17 = vunpack.c.0.s8 %v62_v13  ;;  %v124_v26 = vcvt.s32.f32 %v92_v21  ;;  %v148_v21 = vld [vmem:[#allocation2 + $0x18] sm:$0xff] }
  0x36   :  { %v122_v18 = vcvt.s32.f32 %v90_v15 }
  0x37   :  { %1096 = vperm.xlu0 %1839, %v1432_v32   ;;  %1101 = vperm.xlu1 %1840, %v1433_v33   ;;  %v123_v22 = vcvt.s32.f32 %v91_v17  ;;  %v1386_v32 = vld [vmem:[%s2400_s3 + $0x20] sm:$0xff]  ;;  %v1387_v33 = vld [vmem:[%s2400_s3 + $0x28] sm:$0xff] }
  0x38   :  { %1614 = vmatmul.mubr.f32.gmra.mrb[10].mxu0 %v106_v23  ;;  %v93_v23 = vunpack.c.2.s8 %v62_v13 }
  0x39   :  { %1616 = vmatprep.mubr.f32.mxu0 %v107_v27  ;;  %v94_v27 = vunpack.c.3.s8 %v62_v13 }
  0x3a   :  { %v125_v29 = vcvt.s32.f32 %v93_v23 }
  0x3b   :  { %1106 = vperm.xlu0 %1839, %v1434_v41   ;;  %1111 = vperm.xlu1 %1840, %v1435_v42   ;;  %v126_v31 = vcvt.s32.f32 %v94_v27  ;;  %v489_v41 = vld [vmem:[%s2400_s3 + $0x8] sm:$0xff] }
  0x3c   :  { %1617 = vmatmul.mubr.f32.gmra.mrb[12].mxu0 %v108_v36  ;;  %v1774_v36 = vpack.c.bf16 %v1387_v33, %v1386_v32  ;;  %v2179_v42 = vpack.c.bf16 %v489_v41, %v488_v40  ;;  %v150_v33 = vld [vmem:[#allocation2 + $0x28] sm:$0xff] }
  0x3d   :  { %1619 = vmatprep.mubr.f32.mxu0 %v109_v38  ;;  %v1389_v38 = vld [vmem:[%s2400_s3 + $0x38] sm:$0xff] }
  0x3e   :  { %1775 = vmatprep.subr.bf16.mxu0 %v1774_v36  ;;  %1798 = vmatprep.subr.bf16.mxu1 %v1774_v36  ;;  %v1778_v39 = vpack.c.bf16 %v1389_v38, %v1388_v37 }
  0x3f   :  { %526 = vperm.xlu0 %1839, %v508_v48   ;;  %531 = vperm.xlu1 %1840, %v509_v49  }
  0x40   :  { %1620 = vmatmul.mubr.f32.gmra.mrb[14].mxu0 %v110_v43  ;;  %1800 = vmatpush3.bf16.msra.mxu1 %v1774_v36 }
  0x41   :  { %1622 = vmatprep.mubr.f32.mxu0 %v111_v45  ;;  %1777 = vmatpush3.bf16.msra.mxu0 %v1774_v36  ;;  %v149_v36 = vld [vmem:[#allocation2 + $0x20] sm:$0xff] }
  0x42   :  { %1779 = vmatprep.subr.bf16.mxu0 %v1778_v39  ;;  %1799 = vmatprep.subr.bf16.mxu1 %v1778_v39 }
  0x43   :  { %1116 = vperm.xlu0 %1839, %v1436_v54   ;;  %1121 = vperm.xlu1 %1840, %v1437_v55  }
  0x44   :  { %1623 = vmatmul.mubr.f32.gmra.mrb[16].mxu0 %v112_v50  ;;  %1801 = vmatpush3.bf16.msra.mxu1 %v1778_v39 }
  0x45   :  { %1625 = vmatprep.mubr.f32.mxu0 %v113_v52  ;;  %1781 = vmatpush3.bf16.msra.mxu0 %v1778_v39 }
  0x46   :  { %1783 = vmatprep.subr.bf16.mxu1 %v2179_v42 }
  0x48   :  { %1626 = vmatmul.mubr.f32.gmra.mrb[18].mxu0 %v114_v56 }
  0x49   :  { %1628 = vmatprep.mubr.f32.mxu0 %v115_v58 }
  0x4c   :  { %1629 = vmatmul.mubr.f32.gmra.mrb[20].mxu0 %v116_v61 }
  0x4d   :  { %1631 = vmatprep.mubr.f32.mxu0 %v117_v63 }
  0x50   :  { %1632 = vmatmul.mubr.f32.gmra.mrb[22].mxu0 %v118_v5 }
  0x51   :  { %1634 = vmatprep.mubr.f32.mxu0 %v119_v9  ;;  %v146_v9 = vld [vmem:[#allocation2 + $0x8] sm:$0xff] }
  0x54   :  { %1635 = vmatmul.mubr.f32.gmra.mrb[24].mxu0 %v120_v14  ;;  %v145_v14 = vld [vmem:[#allocation2] sm:$0xff] }
  0x55   :  { %1637 = vmatprep.mubr.f32.mxu0 %v121_v16 }
  0x58   :  { %1638 = vmatmul.mubr.f32.gmra.mrb[26].mxu0 %v122_v18 }
  0x59   :  { %1640 = vmatprep.mubr.f32.mxu0 %v123_v22  ;;  %v147_v22 = vld [vmem:[#allocation2 + $0x10] sm:$0xff] }
  0x5c   :  { %1641 = vmatmul.mubr.f32.gmra.mrb[28].mxu0 %v124_v26 }
  0x5d   :  { %1643 = vmatprep.mubr.f32.mxu0 %v125_v29 }
  0x60   :  { %1644 = vmatmul.mubr.f32.gmra.mrb[30].mxu0 %v126_v31 }
  0x84   :  { %v2184_v44 = vpop.permute.xlu0 %536 }
  0x85   :  { %v2182_v43 = vpop.permute.xlu1 %546 }
  0x88   :  { %v2188_v46 = vpop.permute.xlu0 %541 }
  0x89   :  { %v2186_v45 = vpop.permute.xlu1 %551 }
  0x8c   :  { %v2192_v48 = vpop.permute.xlu0 %556 }
  0x8d   :  { %v2190_v47 = vpop.permute.xlu1 %561 }
  0x92   :  { %v2194_v49 = vpop.permute.xlu1 %571  ;;  %v2196_v50 = vpop.permute.xlu0 %566 }
  0x96   :  { %v2198_v51 = vpop.permute.xlu1 %581  ;;  %v2200_v52 = vpop.permute.xlu0 %576 }
  0x9a   :  { %v2202_v53 = vpop.permute.xlu1 %591  ;;  %v2204_v54 = vpop.permute.xlu0 %586 }
  0x9e   :  { %v2206_v55 = vpop.permute.xlu1 %601  ;;  %v2208_v56 = vpop.permute.xlu0 %596 }
  0xa2   :  { %v2210_v57 = vpop.permute.xlu1 %1051  ;;  %v2212_v58 = vpop.permute.xlu0 %1046 }
  0xa6   :  { %v2214_v59 = vpop.permute.xlu1 %1061  ;;  %v2216_v60 = vpop.permute.xlu0 %1056 }
  0xaa   :  { %v2218_v61 = vpop.permute.xlu1 %1071  ;;  %v2220_v62 = vpop.permute.xlu0 %1066 }
  0xae   :  { %v2222_v63 = vpop.permute.xlu1 %1081  ;;  %v2224_v3 = vpop.permute.xlu0 %1076 }
  0xb2   :  { %v2226_v5 = vpop.permute.xlu1 %1091  ;;  %v2228_v6 = vpop.permute.xlu0 %1086 }
  0xb6   :  { %v2230_v10 = vpop.permute.xlu1 %1101  ;;  %v2232_v13 = vpop.permute.xlu0 %1096 }
  0xba   :  { %v2236_v26 = vpop.permute.xlu1 %1111  ;;  %v2238_v27 = vpop.permute.xlu0 %1106 }
  0xbe   :  { %v532_v41 = vpop.permute.xlu1 %531 }
  0xf7   :  { %v1600_v15 = vpop.f32.mrb[0].mxu0 }
  0xf8   :  { %v403_v16 = vadd.f32 %v1600_v15, %v146_v9  ;;  %v243_v17 = vpop.f32.mrb[1].mxu0  ;;  %v527_v15 = vpop.permute.xlu0 %526 }
  0xf9   :  { %v402_v18 = vadd.f32 %v243_v17, %v145_v14  ;;  %v152_v14 = vld [vmem:[#allocation2 + $0x38] sm:$0xff]  ;;  %v151_v17 = vld [vmem:[#allocation2 + $0x30] sm:$0xff] }
  0xfa   :  { %436 = vst.msk [vmem:[#allocation2 + $0x8] sm:$0xff] %vm22_vm0, %v403_v16 }
  0xfb   :  { %435 = vst.msk [vmem:[#allocation2] sm:$0xff] %vm22_vm0, %v402_v18  ;;  %v1603_v23 = vpop.f32.mrb[2].mxu0 }
  0xfc   :  { %v405_v29 = vadd.f32 %v1603_v23, %v148_v21  ;;  %v253_v31 = vpop.f32.mrb[3].mxu0 }
  0xfd   :  { %v404_v32 = vadd.f32 %v253_v31, %v147_v22  ;;  %v154_v31 = vld [vmem:[#allocation2 + $0x48] sm:$0xff] }
  0xfe   :  { %438 = vst.msk [vmem:[#allocation2 + $0x18] sm:$0xff] %vm22_vm0, %v405_v29 }
  0xff   :  { %437 = vst.msk [vmem:[#allocation2 + $0x10] sm:$0xff] %vm22_vm0, %v404_v32  ;;  %v1606_v37 = vpop.f32.mrb[4].mxu0 }
 0x100   :  { %v407_v38 = vadd.f32 %v1606_v37, %v150_v33  ;;  %v263_v39 = vpop.f32.mrb[5].mxu0  ;;  %v491_v37 = vld [vmem:[%s2400_s3 + $0x18] sm:$0xff] }
 0x101   :  { %v406_v40 = vadd.f32 %v263_v39, %v149_v36  ;;  %v493_v9 = vld [vmem:[#allocation2 + $0x8] sm:$0xff]  ;;  %v490_v36 = vld [vmem:[%s2400_s3 + $0x10] sm:$0xff] }
 0x102   :  { %v492_v16 = vld [vmem:[#allocation2] sm:$0xff]  ;;  %440 = vst.msk [vmem:[#allocation2 + $0x28] sm:$0xff] %vm22_vm0, %v407_v38  ;;  %v605_v22 = vmul.f32 %v532_v41, %v493_v9 }
 0x103   :  { %v604_v18 = vmul.f32 %v527_v15, %v492_v16  ;;  %439 = vst.msk [vmem:[#allocation2 + $0x20] sm:$0xff] %vm22_vm0, %v406_v40  ;;  %v1609_v21 = vpop.f32.mrb[6].mxu0  ;;  %v153_v38 = vld [vmem:[#allocation2 + $0x40] sm:$0xff]  ;;  %v156_v16 = vld [vmem:[#allocation2 + $0x58] sm:$0xff] }
 0x104   :  { %v409_v23 = vadd.f32 %v1609_v21, %v152_v14  ;;  %v273_v29 = vpop.f32.mrb[7].mxu0 }
 0x105   :  { %v408_v32 = vadd.f32 %v273_v29, %v151_v17  ;;  %1654 = vmatprep.mubr.msk.f32.mxu0 %vm22_vm0, %v604_v18  ;;  %v495_v33 = vld [vmem:[#allocation2 + $0x18] sm:$0xff]  ;;  %v1786_v17 = vpack.c.bf16 %v491_v37, %v490_v36 }
 0x106   :  { %442 = vst.msk [vmem:[#allocation2 + $0x38] sm:$0xff] %vm22_vm0, %v409_v23  ;;  %1655 = vmatmul.mubr.msk.f32.vlgmr.msra.gmra.mrb[32].mxu0 %vm22_vm0, %v605_v22  ;;  %v494_v39 = vld [vmem:[#allocation2 + $0x10] sm:$0xff]  ;;  %v607_v15 = vmul.f32 %v2188_v46, %v495_v33  ;;  %v1438_v22 = vld [vmem:[%s2400_s3 + $0x40] sm:$0xff]  ;;  %v1439_v23 = vld [vmem:[%s2400_s3 + $0x48] sm:$0xff] }
 0x107   :  { %441 = vst.msk [vmem:[#allocation2 + $0x30] sm:$0xff] %vm22_vm0, %v408_v32  ;;  %v1612_v40 = vpop.f32.mrb[8].mxu0  ;;  %v606_v41 = vmul.f32 %v2184_v44, %v494_v39  ;;  %v155_v44 = vld [vmem:[#allocation2 + $0x50] sm:$0xff]  ;;  %v2269_v37 = vpack.c.bf16 %v1439_v23, %v1438_v22  ;;  %v158_v39 = vld [vmem:[#allocation2 + $0x68] sm:$0xff] }
 0x108   :  { %v411_v9 = vadd.f32 %v1612_v40, %v154_v31  ;;  %v283_v14 = vpop.f32.mrb[9].mxu0  ;;  %v159_v22 = vld [vmem:[#allocation2 + $0x70] sm:$0xff] }
 0x109   :  { %v410_v18 = vadd.f32 %v283_v14, %v153_v38  ;;  %1657 = vmatprep.mubr.msk.f32.mxu1 %vm22_vm0, %v606_v41  ;;  %v497_v21 = vld [vmem:[#allocation2 + $0x28] sm:$0xff] }
 0x10a   :  { %444 = vst.msk [vmem:[#allocation2 + $0x48] sm:$0xff] %vm22_vm0, %v411_v9  ;;  %1658 = vmatmul.mubr.msk.f32.vlgmr.msra.gmra.mrb[0].mxu1 %vm22_vm0, %v607_v15  ;;  %v496_v46 = vld [vmem:[#allocation2 + $0x20] sm:$0xff]  ;;  %v609_v36 = vmul.f32 %v2186_v45, %v497_v21 }
 0x10b   :  { %443 = vst.msk [vmem:[#allocation2 + $0x40] sm:$0xff] %vm22_vm0, %v410_v18  ;;  %1785 = vmatpush3.bf16.msra.mxu1 %v2179_v42  ;;  %v1615_v29 = vpop.f32.mrb[10].mxu0  ;;  %v608_v31 = vmul.f32 %v2182_v43, %v496_v46  ;;  %v157_v42 = vld [vmem:[#allocation2 + $0x60] sm:$0xff]  ;;  %v160_v18 = vld [vmem:[#allocation2 + $0x78] sm:$0xff] }
 0x10c   :  { %v413_v32 = vadd.f32 %v1615_v29, %v156_v16  ;;  %v293_v33 = vpop.f32.mrb[11].mxu0  ;;  %1787 = vmatprep.subr.bf16.mxu1 %v1786_v17 }
 0x10d   :  { %v412_v38 = vadd.f32 %v293_v33, %v155_v44  ;;  %1660 = vmatprep.mubr.msk.f32.mxu1 %vm22_vm0, %v608_v31  ;;  %v499_v40 = vld [vmem:[#allocation2 + $0x38] sm:$0xff]  ;;  %v162_v31 = vld [vmem:[#allocation2 + $0x88] sm:$0xff]  ;;  %v161_v33 = vld [vmem:[#allocation2 + $0x80] sm:$0xff] }
 0x10e   :  { %446 = vst.msk [vmem:[#allocation2 + $0x58] sm:$0xff] %vm22_vm0, %v413_v32  ;;  %1661 = vmatmul.mubr.msk.f32.gmra.mrb[2].mxu1 %vm22_vm0, %v609_v36  ;;  %v498_v41 = vld [vmem:[#allocation2 + $0x30] sm:$0xff]  ;;  %v611_v15 = vmul.f32 %v2190_v47, %v499_v40 }
 0x10f   :  { %445 = vst.msk [vmem:[#allocation2 + $0x50] sm:$0xff] %vm22_vm0, %v412_v38  ;;  %v1618_v43 = vpop.f32.mrb[12].mxu0  ;;  %v610_v9 = vmul.f32 %v2192_v48, %v498_v41  ;;  %1789 = vmatpush3.bf16.msra.mxu1 %v1786_v17  ;;  %v164_v41 = vld [vmem:[#allocation2 + $0x98] sm:$0xff] }
 0x110   :  { %v415_v45 = vadd.f32 %v1618_v43, %v158_v39  ;;  %v303_v14 = vpop.f32.mrb[13].mxu0  ;;  %1791 = vmatprep.subr.bf16.mxu1 %v2269_v37 }
 0x111   :  { %v414_v16 = vadd.f32 %v303_v14, %v157_v42  ;;  %1663 = vmatprep.mubr.msk.f32.mxu1 %vm22_vm0, %v610_v9  ;;  %v501_v21 = vld [vmem:[#allocation2 + $0x48] sm:$0xff]  ;;  %v163_v9 = vld [vmem:[#allocation2 + $0x90] sm:$0xff] }
 0x112   :  { %448 = vst.msk [vmem:[#allocation2 + $0x68] sm:$0xff] %vm22_vm0, %v415_v45  ;;  %1664 = vmatmul.mubr.msk.f32.gmra.mrb[4].mxu1 %vm22_vm0, %v611_v15  ;;  %v500_v23 = vld [vmem:[#allocation2 + $0x40] sm:$0xff]  ;;  %v613_v46 = vmul.f32 %v2194_v49, %v501_v21  ;;  %v166_v21 = vld [vmem:[#allocation2 + $0xa8] sm:$0xff] }
 0x113   :  { %447 = vst.msk [vmem:[#allocation2 + $0x60] sm:$0xff] %vm22_vm0, %v414_v16  ;;  %v1621_v48 = vpop.f32.mrb[14].mxu0  ;;  %v612_v17 = vmul.f32 %v2196_v50, %v500_v23  ;;  %v165_v23 = vld [vmem:[#allocation2 + $0xa0] sm:$0xff] }
 0x114   :  { %v417_v44 = vadd.f32 %v1621_v48, %v160_v18  ;;  %v313_v47 = vpop.f32.mrb[15].mxu0 }
 0x115   :  { %v416_v29 = vadd.f32 %v313_v47, %v159_v22  ;;  %1666 = vmatprep.mubr.msk.f32.mxu1 %vm22_vm0, %v612_v17  ;;  %v503_v32 = vld [vmem:[#allocation2 + $0x58] sm:$0xff] }
 0x116   :  { %450 = vst.msk [vmem:[#allocation2 + $0x78] sm:$0xff] %vm22_vm0, %v417_v44  ;;  %1667 = vmatmul.mubr.msk.f32.gmra.mrb[6].mxu1 %vm22_vm0, %v613_v46  ;;  %v502_v36 = vld [vmem:[#allocation2 + $0x50] sm:$0xff]  ;;  %v615_v49 = vmul.f32 %v2198_v51, %v503_v32  ;;  %v1441_v32 = vld [vmem:[%s2400_s3 + $0x58] sm:$0xff] }
 0x117   :  { %449 = vst.msk [vmem:[#allocation2 + $0x70] sm:$0xff] %vm22_vm0, %v416_v29  ;;  %v1624_v38 = vpop.f32.mrb[16].mxu0  ;;  %v614_v50 = vmul.f32 %v2200_v52, %v502_v36  ;;  %v168_v29 = vld [vmem:[#allocation2 + $0xb8] sm:$0xff] }
 0x118   :  { %v419_v39 = vadd.f32 %v1624_v38, %v162_v31  ;;  %v323_v40 = vpop.f32.mrb[17].mxu0  ;;  %v1440_v31 = vld [vmem:[%s2400_s3 + $0x50] sm:$0xff]  ;;  %s1867_s3 = smov [#allocation3]  }
 0x119   :  { %v418_v42 = vadd.f32 %v323_v40, %v161_v33  ;;  %1669 = vmatprep.mubr.msk.f32.mxu1 %vm22_vm0, %v614_v50  ;;  %v505_v43 = vld [vmem:[#allocation2 + $0x68] sm:$0xff]  ;;  %v1794_v38 = vpack.c.bf16 %v1441_v32, %v1440_v31  ;;  %v169_v40 = vld [vmem:[#allocation2 + $0xc0] sm:$0xff]  ;;  %v1117_v32 = vpop.permute.xlu0 %1116  ;;  %s1375_s16 = sshll.u32 %s1867_s3, 4  ;;  %s1376_s16 = int_to_ptr.vmem [resolvable:$true] %s1375_s16 }
 0x11a   :  { %452 = vst.msk [vmem:[#allocation2 + $0x88] sm:$0xff] %vm22_vm0, %v419_v39  ;;  %1670 = vmatmul.mubr.msk.f32.gmra.mrb[8].mxu1 %vm22_vm0, %v615_v49  ;;  %v504_v45 = vld [vmem:[#allocation2 + $0x60] sm:$0xff]  ;;  %v617_v51 = vmul.f32 %v2202_v53, %v505_v43  ;;  %v170_v39 = vld [vmem:[#allocation2 + $0xc8] sm:$0xff]  ;;  %v172_v43 = vld [vmem:[#allocation2 + $0xd8] sm:$0xff]  ;;  %s1841_s17 = scalar_lea.vmem %s1376_s16, 2048  ;;  %p1846_p1 = scmp.lt.s32.totalorder %s1376_s16, %s1376_s16 }
 0x11b   :  { %451 = vst.msk [vmem:[#allocation2 + $0x80] sm:$0xff] %vm22_vm0, %v418_v42  ;;  %v1627_v14 = vpop.f32.mrb[18].mxu0  ;;  %v616_v52 = vmul.f32 %v2204_v54, %v504_v45  ;;  %p1842_p0 = scmp.ne.s32.totalorder %s1376_s16, %s1841_s17  ;;  %p1847_p2 = scmp.lt.s32.totalorder %s1841_s17, %s1841_s17 }
 0x11c   :  { %v421_v15 = vadd.f32 %v1627_v14, %v164_v41  ;;  %v333_v16 = vpop.f32.mrb[19].mxu0  ;;  %v174_v14 = vld [vmem:[#allocation2 + $0xe8] sm:$0xff] }
 0x11d   :  { %v420_v18 = vadd.f32 %v333_v16, %v163_v9  ;;  %1672 = vmatprep.mubr.msk.f32.mxu1 %vm22_vm0, %v616_v52  ;;  %v507_v22 = vld [vmem:[#allocation2 + $0x78] sm:$0xff]  ;;  %v173_v52 = vld [vmem:[#allocation2 + $0xe0] sm:$0xff]  ;;  %p1848_p3 = por %p1847_p2, %p1846_p1 }
 0x11e   :  { %454 = vst.msk [vmem:[#allocation2 + $0x98] sm:$0xff] %vm22_vm0, %v421_v15  ;;  %1673 = vmatmul.mubr.msk.f32.gmra.mrb[10].mxu1 %vm22_vm0, %v617_v51  ;;  %v506_v48 = vld [vmem:[#allocation2 + $0x70] sm:$0xff]  ;;  %v619_v53 = vmul.f32 %v2206_v55, %v507_v22  ;;  %v176_v51 = vld [vmem:[#allocation2 + $0xf8] sm:$0xff] }
 0x11f   :  { %453 = vst.msk [vmem:[#allocation2 + $0x90] sm:$0xff] %vm22_vm0, %v420_v18  ;;  %v1630_v17 = vpop.f32.mrb[20].mxu0  ;;  %v618_v54 = vmul.f32 %v2208_v56, %v506_v48  ;;  %v167_v56 = vld [vmem:[#allocation2 + $0xb0] sm:$0xff]  ;;  %p1849_p4 = pnand %p1848_p3, %p1842_p0 }
 0x120   :  { %v423_v44 = vadd.f32 %v1630_v17, %v166_v21  ;;  %v343_v47 = vpop.f32.mrb[21].mxu0  ;;  %v175_v18 = vld [vmem:[#allocation2 + $0xf0] sm:$0xff] }
 0x121   :  { %v422_v46 = vadd.f32 %v343_v47, %v165_v23  ;;  %1675 = vmatprep.mubr.msk.f32.mxu1 %vm22_vm0, %v618_v54 }
 0x122   :  { %456 = vst.msk [vmem:[#allocation2 + $0xa8] sm:$0xff] %vm22_vm0, %v423_v44  ;;  %1676 = vmatmul.mubr.msk.f32.gmra.mrb[12].mxu1 %vm22_vm0, %v619_v53 }
 0x123   :  { %455 = vst.msk [vmem:[#allocation2 + $0xa0] sm:$0xff] %vm22_vm0, %v422_v46  ;;  %v1633_v55 = vpop.f32.mrb[22].mxu0  ;;  %1686 = vmatprep.mubr.msk.f32.mxu1 %vm22_vm0, %v1898_v0 }
 0x124   :  { %v425_v33 = vadd.f32 %v1633_v55, %v168_v29  ;;  %v353_v36 = vpop.f32.mrb[23].mxu0  ;;  %v1122_v55 = vpop.permute.xlu1 %1121 }
 0x125   :  { %v424_v50 = vadd.f32 %v353_v36, %v167_v56 }
 0x126   :  { %458 = vst.msk [vmem:[#allocation2 + $0xb8] sm:$0xff] %vm22_vm0, %v425_v33  ;;  %1687 = vmatmul.mubr.msk.f32.vlgmr.msra.gmra.mrb[14].mxu1 %vm22_vm0, %v1903_v1  ;;  %v171_v1 = vld [vmem:[#allocation2 + $0xd0] sm:$0xff] }
 0x127   :  { %457 = vst.msk [vmem:[#allocation2 + $0xb0] sm:$0xff] %vm22_vm0, %v424_v50  ;;  %1793 = vmatpush3.bf16.msra.mxu1 %v2269_v37  ;;  %v1636_v49 = vpop.f32.mrb[24].mxu0  ;;  %1689 = vmatprep.mubr.msk.f32.mxu1 %vm22_vm0, %v1908_v2 }
 0x128   :  { %v427_v0 = vadd.f32 %v1636_v49, %v170_v39  ;;  %v363_v42 = vpop.f32.mrb[25].mxu0  ;;  %1795 = vmatprep.subr.bf16.mxu1 %v1794_v38 }
 0x129   :  { %v426_v41 = vadd.f32 %v363_v42, %v169_v40  ;;  %v1016_v48 = vld [vmem:[#allocation2 + $0xa8] sm:$0xff] }
 0x12a   :  { %460 = vst.msk [vmem:[#allocation2 + $0xc8] sm:$0xff] %vm22_vm0, %v427_v0  ;;  %1690 = vmatmul.mubr.msk.f32.gmra.mrb[0].mxu1 %vm22_vm0, %v1915_v4 }
 0x12b   :  { %459 = vst.msk [vmem:[#allocation2 + $0xc0] sm:$0xff] %vm22_vm0, %v426_v41  ;;  %v1639_v9 = vpop.f32.mrb[26].mxu0  ;;  %1692 = vmatprep.mubr.msk.f32.mxu1 %vm22_vm0, %v1922_v7  ;;  %1797 = vmatpush3.bf16.msra.mxu1 %v1794_v38 }
 0x12c   :  { %v429_v37 = vadd.f32 %v1639_v9, %v172_v43  ;;  %v373_v2 = vpop.f32.mrb[27].mxu0 }
 0x12d   :  { %v428_v45 = vadd.f32 %v373_v2, %v171_v1  ;;  %v1018_v17 = vld [vmem:[#allocation2 + $0xb8] sm:$0xff] }
 0x12e   :  { %462 = vst.msk [vmem:[#allocation2 + $0xd8] sm:$0xff] %vm22_vm0, %v429_v37  ;;  %1693 = vmatmul.mubr.msk.f32.gmra.mrb[2].mxu1 %vm22_vm0, %v1927_v8 }
 0x12f   :  { %461 = vst.msk [vmem:[#allocation2 + $0xd0] sm:$0xff] %vm22_vm0, %v428_v45  ;;  %v1642_v4 = vpop.f32.mrb[28].mxu0  ;;  %1695 = vmatprep.mubr.msk.f32.mxu1 %vm22_vm0, %v1939_v11  ;;  %v1011_v11 = vld [vmem:[#allocation2 + $0x80] sm:$0xff] }
 0x130   :  { %v431_v15 = vadd.f32 %v1642_v4, %v174_v14  ;;  %v383_v16 = vpop.f32.mrb[29].mxu0 }
 0x131   :  { %v430_v7 = vadd.f32 %v383_v16, %v173_v52  ;;  %v1020_v44 = vld [vmem:[#allocation2 + $0xc8] sm:$0xff] }
 0x132   :  { %464 = vst.msk [vmem:[#allocation2 + $0xe8] sm:$0xff] %vm22_vm0, %v431_v15  ;;  %1696 = vmatmul.mubr.msk.f32.gmra.mrb[4].mxu1 %vm22_vm0, %v1944_v12  ;;  %v1124_v12 = vmul.f32 %v2212_v58, %v1011_v11  ;;  %v1019_v54 = vld [vmem:[#allocation2 + $0xc0] sm:$0xff] }
 0x133   :  { %463 = vst.msk [vmem:[#allocation2 + $0xe0] sm:$0xff] %vm22_vm0, %v430_v7  ;;  %v1645_v8 = vpop.f32.mrb[30].mxu0  ;;  %1698 = vmatprep.mubr.msk.f32.mxu1 %vm22_vm0, %v1961_v19  ;;  %v1012_v19 = vld [vmem:[#allocation2 + $0x88] sm:$0xff] }
 0x134   :  { %v433_v21 = vadd.f32 %v1645_v8, %v176_v51  ;;  %v393_v22 = vpop.f32.mrb[31].mxu0 }
 0x135   :  { %v432_v23 = vadd.f32 %v393_v22, %v175_v18  ;;  %v1022_v53 = vld [vmem:[#allocation2 + $0xd8] sm:$0xff] }
 0x136   :  { %466 = vst.msk [vmem:[#allocation2 + $0xf8] sm:$0xff] %vm22_vm0, %v433_v21  ;;  %1699 = vmatmul.mubr.msk.f32.gmra.mrb[6].mxu1 %vm22_vm0, %v1966_v20  ;;  %v1013_v20 = vld [vmem:[#allocation2 + $0x90] sm:$0xff] }
 0x137   :  { %465 = vst.msk [vmem:[#allocation2 + $0xf0] sm:$0xff] %vm22_vm0, %v432_v23  ;;  %1701 = vmatprep.mubr.msk.f32.mxu1 %vm22_vm0, %v1979_v24  ;;  %v1125_v24 = vmul.f32 %v2210_v57, %v1012_v19  ;;  %v1129_v57 = vmul.f32 %v2218_v61, %v1016_v48  ;;  %v1021_v47 = vld [vmem:[#allocation2 + $0xd0] sm:$0xff]  ;;  %v1133_v61 = vmul.f32 %v2226_v5, %v1020_v44 }
 0x139   :  { %v1024_v29 = vld [vmem:[#allocation2 + $0xe8] sm:$0xff] }
 0x13a   :  { %1702 = vmatmul.mubr.msk.f32.gmra.mrb[8].mxu1 %vm22_vm0, %v1984_v25  ;;  %v1126_v25 = vmul.f32 %v2216_v60, %v1013_v20  ;;  %v1023_v46 = vld [vmem:[#allocation2 + $0xe0] sm:$0xff]  ;;  %v1137_v5 = vmul.f32 %v2236_v26, %v1024_v29 }
 0x13b   :  { %1704 = vmatprep.mubr.msk.f32.mxu1 %vm22_vm0, %v1994_v28  ;;  %v1014_v28 = vld [vmem:[#allocation2 + $0x98] sm:$0xff] }
 0x13d   :  { %v1026_v56 = vld [vmem:[#allocation2 + $0xf8] sm:$0xff] }
 0x13e   :  { %1705 = vmatmul.mubr.msk.f32.gmra.mrb[10].mxu1 %vm22_vm0, %v2002_v30  ;;  %v1015_v30 = vld [vmem:[#allocation2 + $0xa0] sm:$0xff]  ;;  %v1025_v31 = vld [vmem:[#allocation2 + $0xf0] sm:$0xff]  ;;  %v1139_v33 = vmul.f32 %v1122_v55, %v1026_v56 }
 0x13f   :  { %1707 = vmatprep.mubr.msk.f32.mxu1 %vm22_vm0, %v2015_v34  ;;  %v1127_v34 = vmul.f32 %v2214_v59, %v1014_v28  ;;  %v1128_v58 = vmul.f32 %v2220_v62, %v1015_v30  ;;  %v1131_v59 = vmul.f32 %v2222_v63, %v1018_v17  ;;  %v1132_v62 = vmul.f32 %v2228_v6, %v1019_v54 }
 0x140   :  { %v1135_v63 = vmul.f32 %v2230_v10, %v1022_v53  ;;  %v1136_v6 = vmul.f32 %v2238_v27, %v1023_v46 }
 0x142   :  { %1708 = vmatmul.mubr.msk.f32.gmra.mrb[12].mxu1 %vm22_vm0, %v2020_v35  ;;  %v1017_v35 = vld [vmem:[#allocation2 + $0xb0] sm:$0xff] }
 0x143   :  { %1718 = vmatprep.mubr.msk.f32.mxu1 %vm22_vm0, %v1124_v12  ;;  %v1130_v60 = vmul.f32 %v2224_v3, %v1017_v35  ;;  %v1134_v3 = vmul.f32 %v2232_v13, %v1021_v47  ;;  %v1138_v13 = vmul.f32 %v1117_v32, %v1025_v31 }
 0x146   :  { %1719 = vmatmul.mubr.msk.f32.vlgmr.msra.gmra.mrb[14].mxu1 %vm22_vm0, %v1125_v24 }
 0x147   :  { %1721 = vmatprep.mubr.msk.f32.mxu1 %vm22_vm0, %v1126_v25 }
 0x14a   :  { %1722 = vmatmul.mubr.msk.f32.gmra.mrb[0].mxu1 %vm22_vm0, %v1127_v34 }
 0x14b   :  { %1724 = vmatprep.mubr.msk.f32.mxu1 %vm22_vm0, %v1128_v58 }
 0x14e   :  { %1725 = vmatmul.mubr.msk.f32.gmra.mrb[2].mxu1 %vm22_vm0, %v1129_v57 }
 0x14f   :  { %1727 = vmatprep.mubr.msk.f32.mxu1 %vm22_vm0, %v1130_v60 }
 0x152   :  { %1728 = vmatmul.mubr.msk.f32.gmra.mrb[4].mxu1 %vm22_vm0, %v1131_v59 }
 0x153   :  { %1730 = vmatprep.mubr.msk.f32.mxu1 %vm22_vm0, %v1132_v62 }
 0x156   :  { %1731 = vmatmul.mubr.msk.f32.gmra.mrb[6].mxu1 %vm22_vm0, %v1133_v61 }
 0x157   :  { %1733 = vmatprep.mubr.msk.f32.mxu1 %vm22_vm0, %v1134_v3 }
 0x15a   :  { %1734 = vmatmul.mubr.msk.f32.gmra.mrb[8].mxu1 %vm22_vm0, %v1135_v63 }
 0x15b   :  { %1736 = vmatprep.mubr.msk.f32.mxu1 %vm22_vm0, %v1136_v6 }
 0x15e   :  { %1737 = vmatmul.mubr.msk.f32.gmra.mrb[10].mxu1 %vm22_vm0, %v1137_v5 }
 0x15f   :  { %1739 = vmatprep.mubr.msk.f32.mxu1 %vm22_vm0, %v1138_v13 }
 0x162   :  { %1740 = vmatmul.mubr.msk.f32.gmra.mrb[12].mxu1 %vm22_vm0, %v1139_v33 }
 0x1d9   :  { %v1656_v10 = vpop.f32.mrb[32].mxu0 }
 0x1da   :  { %v739_v27 = vpop.f32.mrb[33].mxu0 }
 0x219   :  { %v1720_v36 = vpop.f32.mrb[14].mxu1 }
 0x21a   :  { %v1802_v38 = vadd.f32 %v1720_v36, %v1656_v10  ;;  %v1259_v50 = vpop.f32.mrb[15].mxu1 }
 0x21b   :  { %v1803_v39 = vadd.f32 %v1259_v50, %v739_v27 }
 0x21c   :  { %1355 = vst [vmem:[#allocation3 + $0x8] sm:$0xff] %v1802_v38 }
 0x21d   :  { %1354 = vst [vmem:[#allocation3] sm:$0xff] %v1803_v39  ;;  %v1723_v40 = vpop.f32.mrb[0].mxu1 }
 0x21e   :  { %1357 = vst [vmem:[#allocation3 + $0x18] sm:$0xff] %v1723_v40  ;;  %v1269_v26 = vpop.f32.mrb[1].mxu1 }
 0x21f   :  { %1356 = vst [vmem:[#allocation3 + $0x10] sm:$0xff] %v1269_v26 }
 0x221   :  { %v1726_v49 = vpop.f32.mrb[2].mxu1 }
 0x222   :  { %1359 = vst [vmem:[#allocation3 + $0x28] sm:$0xff] %v1726_v49  ;;  %v1279_v0 = vpop.f32.mrb[3].mxu1 }
 0x223   :  { %1358 = vst [vmem:[#allocation3 + $0x20] sm:$0xff] %v1279_v0 }
 0x225   :  { %v1729_v42 = vpop.f32.mrb[4].mxu1 }
 0x226   :  { %1361 = vst [vmem:[#allocation3 + $0x38] sm:$0xff] %v1729_v42  ;;  %v1289_v41 = vpop.f32.mrb[5].mxu1 }
 0x227   :  { %1360 = vst [vmem:[#allocation3 + $0x30] sm:$0xff] %v1289_v41 }
 0x229   :  { %v1732_v43 = vpop.f32.mrb[6].mxu1 }
 0x22a   :  { %1363 = vst [vmem:[#allocation3 + $0x48] sm:$0xff] %v1732_v43  ;;  %v1299_v1 = vpop.f32.mrb[7].mxu1 }
 0x22b   :  { %1362 = vst [vmem:[#allocation3 + $0x40] sm:$0xff] %v1299_v1 }
 0x22d   :  { %v1735_v9 = vpop.f32.mrb[8].mxu1 }
 0x22e   :  { %1365 = vst [vmem:[#allocation3 + $0x58] sm:$0xff] %v1735_v9  ;;  %v1309_v37 = vpop.f32.mrb[9].mxu1 }
 0x22f   :  { %1364 = vst [vmem:[#allocation3 + $0x50] sm:$0xff] %v1309_v37 }
 0x231   :  { %v1738_v2 = vpop.f32.mrb[10].mxu1 }
 0x232   :  { %1367 = vst [vmem:[#allocation3 + $0x68] sm:$0xff] %v1738_v2  ;;  %v1319_v45 = vpop.f32.mrb[11].mxu1 }
 0x233   :  { %1366 = vst [vmem:[#allocation3 + $0x60] sm:$0xff] %v1319_v45 }
 0x235   :  { %v1741_v14 = vpop.f32.mrb[12].mxu1 }
 0x236   :  { %1369 = vst [vmem:[#allocation3 + $0x78] sm:$0xff] %v1741_v14  ;;  %v1329_v52 = vpop.f32.mrb[13].mxu1 }
 0x237   :  { %1368 = vst [vmem:[#allocation3 + $0x70] sm:$0xff] %v1329_v52 }
 0x238   :  { %1852 = shalt.err (!%p1849_p4)
}
 0x239   :  { %s1853_s19 = scalar_lea.hbm %s2401_s4, 2048 }
 0x23a   :  { %p1854_p5 = scmp.ne.s32.totalorder %s2401_s4, %s1853_s19  ;;  %p1857_p6 = scmp.lt.u32.totalorder %s1853_s19, %s2401_s4 }
 0x23c   :  { %p1859_p7 = pnand %p1857_p6, %p1854_p5 }
 0x23e   :  { %1862 = shalt.err (!%p1859_p7)
}
 0x23f   :  { %s1868_s22 = smov 128   ;;  %s1869_s23 = smov 8  }
 0x240   :  { %1381 = dma.vmem_to_hbm [thread:$0]  %s1376_s16, 2048, %s2401_s4, [#allocation4], %s1868_s22, %s1868_s22, %s1869_s23  }
 0x241   :  { %1863 = dma.done.wait [#allocation4], 2048  }
 0x242   :  { %1864 = vsyncadd [#allocation4], 4294965248 }
 0x243   :  { %1385 = vsyncpa [#allocation4], 1 }

</bundles_post_ra>
